<compile_context>
chip_gen: v6e
topology: v6e:2x2x1
jax: 0.10.0
libtpu: 0.0.40
codegen_flags: <defaults>
</compile_context>

<pallas_src>
import jax
import jax.numpy as jnp
from jax.experimental import pallas as pl
from jax.experimental.pallas import tpu as pltpu


def attention_kernel(x_ref, w_ref, ctx_ref, a_ref):
    # x_ref: (TB, S, D)   w_ref: (1, 1, D)   ctx_ref: (TB, D)   a_ref: (TB, S)
    x = x_ref[...]
    w = w_ref[...]                                   # (1, 1, D), lane-aligned

    # eij = tanh(x @ W): D (feature) is the lane dim, so the (D, 1) mat-vec is
    # a lane-wise multiply + lane reduce (D << 128; the MXU would be masked).
    eij = jnp.tanh(jnp.sum(x * w, axis=-1))          # (TB, S)

    # Normalization matching torch exactly: exp / sum + 1e-10.
    # (No max-subtraction on purpose: tanh bounds eij to [-1, 1], and the
    #  torch reference does not subtract a max either.)
    a = jnp.exp(eij)                                 # (TB, S)
    denom = jnp.sum(a, axis=-1, keepdims=True)       # (TB, 1)
    # Multiply by the reciprocal instead of dividing S times per row.
    # approx=False keeps full f32 precision (a is returned to the caller).
    a = a * pl.reciprocal(denom, approx=False) + 1e-10

    # Weighted sum over the step dimension (sublane reduce over S).
    ctx_ref[...] = jnp.sum(x * a[:, :, None], axis=1)  # (TB, D)
    a_ref[...] = a                                      # (TB, S), lane-dense

    # TODO(synk): optional `mask` argument of the torch forward (a = a * mask)
    # is not wired in (mask=None path only); it would be one extra (TB, S) input.
    # TODO(synk): D=32 uses only 32/128 lanes; a lane-packed (B, S/4, 128)
    # layout would recover ~4x effective bandwidth on this memory-bound kernel.


def _pick_batch_tile(batch, step, feat, budget_bytes):
    """Largest TB with TB | batch and TB % 8 == 0 (sublane alignment for the
    2-D output tiles) whose double-buffered f32 working set fits budget_bytes.
    Falls back to the whole batch as a single block if no aligned tile divides."""
    bytes_per_row = 4 * (step * feat + feat + step)          # x + ctx + a rows, f32
    max_rows = max(1, budget_bytes // (2 * bytes_per_row))   # 2x: double buffer
    if batch <= max_rows or batch % 8 != 0:
        return batch                                         # whole batch, one block
    tb = min(batch, (max_rows // 8) * 8)
    tb = max(tb, 8)
    while tb > 8 and batch % tb != 0:                        # uniform blocks only
        tb -= 8
    return tb if batch % tb == 0 else batch


def attention_forward(x, weight, *, block_b=None, vmem_limit_bytes=32 * 1024 * 1024):
    """x: (B, S, D) float32, weight: (D, 1) float32 (as in the torch module).

    Returns (context, attn) with context: (B, D) and attn: (B, S, 1)."""
    B, S, D = x.shape
    x = x.astype(jnp.float32)
    w_row = weight.reshape(1, 1, D).astype(jnp.float32)   # glue reshape in JAX

    if block_b is None:
        # Keep the pipelined working set well under per-generation scoped VMEM
        # (v5e default 16 MiB, v6e 32 MiB, v7x 64 MiB physical).
        block_b = _pick_batch_tile(B, S, D, budget_bytes=vmem_limit_bytes // 3)
    assert B % block_b == 0, "batch tile must divide the batch"
    grid = (B // block_b,)

    cost = pl.CostEstimate(
        flops=5 * B * S * D,                      # mat-vec + weighted sum + norm
        transcendentals=2 * B * S,                # tanh + exp per (b, s)
        bytes_accessed=4 * (B * S * D + D + B * D + B * S),
    )

    ctx, a = pl.pallas_call(
        attention_kernel,
        grid=grid,
        in_specs=[
            pl.BlockSpec((block_b, S, D), lambda b: (b, 0, 0)),
            pl.BlockSpec((1, 1, D), lambda b: (0, 0, 0)),
        ],
        out_specs=(
            pl.BlockSpec((block_b, D), lambda b: (b, 0)),
            pl.BlockSpec((block_b, S), lambda b: (b, 0)),   # lane-dense a output
        ),
        out_shape=(
            jax.ShapeDtypeStruct((B, D), jnp.float32),
            jax.ShapeDtypeStruct((B, S), jnp.float32),
        ),
        compiler_params=pltpu.CompilerParams(
            dimension_semantics=("parallel",),    # shard batch axis across TCs (v7x)
            vmem_limit_bytes=vmem_limit_bytes,
        ),
        cost_estimate=cost,
    )(x, w_row)
    return ctx, a[..., None]                      # public API: (B, S, 1)


def _reference(x, weight):
    B, S, D = x.shape
    eij = jnp.tanh((x.reshape(-1, D) @ weight).reshape(B, S))
    a = jnp.exp(eij)
    a = a / jnp.sum(a, axis=1, keepdims=True) + 1e-10
    return jnp.sum(x * a[..., None], axis=1), a[..., None]


if __name__ == "__main__":
    B, S, D = 16, 8, 32   # batch, step_dim, feature_dim (small; 2 batch tiles)

    key = jax.random.PRNGKey(0)
    kx, kw = jax.random.split(key)
    x = jax.random.normal(kx, (B, S, D), dtype=jnp.float32)

    # Deterministic xavier_uniform-style init for weight of shape (D, 1):
    # bound = sqrt(6 / (fan_in + fan_out)) = sqrt(6 / (D + 1))
    bound = (6.0 / (D + 1)) ** 0.5
    weight = jax.random.uniform(kw, (D, 1), dtype=jnp.float32,
                                minval=-bound, maxval=bound)

    # Explicit tile of 8 -> grid=(2,): exercises the batch-tiled pipeline path.
    ctx, a = attention_forward(x, weight, block_b=8)
    jax.block_until_ready((ctx, a))

    ctx_ref, a_ref = _reference(x, weight)
    assert ctx.shape == (B, D) and a.shape == (B, S, 1)
    assert jnp.allclose(ctx, ctx_ref, atol=1e-5, rtol=1e-5)
    assert jnp.allclose(a, a_ref, atol=1e-6, rtol=1e-5)

    print("KERNEL_OK")
</pallas_src>

<mosaic_0001>
module attributes {stable_mosaic.version = 11 : i64} {
  func.func @attention_kernel(%arg0: i32, %arg1: memref<8x8x32xf32, #tpu.memory_space<vmem>>, %arg2: memref<1x1x32xf32, #tpu.memory_space<vmem>>, %arg3: memref<8x32xf32, #tpu.memory_space<vmem>>, %arg4: memref<8x8xf32, #tpu.memory_space<vmem>>) attributes {dimension_semantics = [#tpu.dimension_semantics<parallel>], iteration_bounds = array<i64: 2>, scalar_prefetch = 0 : i64, scratch_operands = 0 : i64, tpu.core_type = #tpu.core_type<tc>, window_params = [{transform_indices = @transform_0, window_bounds = array<i64: 8, 8, 32>}, {pipeline_mode = #tpu.pipeline_mode<synchronous>, transform_indices = @transform_1, window_bounds = array<i64: 1, 1, 32>}, {transform_indices = @transform_2, window_bounds = array<i64: 8, 32>}, {transform_indices = @transform_3, window_bounds = array<i64: 8, 8>}]} {
    %c0 = arith.constant 0 : index
    %c0_0 = arith.constant 0 : index
    %c0_1 = arith.constant 0 : index
    %0 = vector.load %arg1[%c0, %c0_0, %c0_1] : memref<8x8x32xf32, #tpu.memory_space<vmem>>, vector<8x8x32xf32>
    %c0_2 = arith.constant 0 : index
    %c0_3 = arith.constant 0 : index
    %c0_4 = arith.constant 0 : index
    %1 = vector.load %arg2[%c0_2, %c0_3, %c0_4] : memref<1x1x32xf32, #tpu.memory_space<vmem>>, vector<1x1x32xf32>
    %2 = vector.broadcast %1 : vector<1x1x32xf32> to vector<8x8x32xf32>
    %3 = arith.mulf %0, %2 : vector<8x8x32xf32>
    %cst = arith.constant dense<0.000000e+00> : vector<8x8xf32>
    %4 = vector.multi_reduction <add>, %3, %cst [2] : vector<8x8x32xf32> to vector<8x8xf32>
    %5 = math.tanh %4 : vector<8x8xf32>
    %6 = math.exp %5 : vector<8x8xf32>
    %cst_5 = arith.constant dense<0.000000e+00> : vector<8xf32>
    %7 = vector.multi_reduction <add>, %6, %cst_5 [1] : vector<8x8xf32> to vector<8xf32>
    %8 = vector.shape_cast %7 : vector<8xf32> to vector<8x1xf32>
    %9 = tpu.reciprocal %8 : vector<8x1xf32> -> vector<8x1xf32>
    %10 = vector.broadcast %9 : vector<8x1xf32> to vector<8x8xf32>
    %11 = arith.mulf %6, %10 : vector<8x8xf32>
    %cst_6 = arith.constant 1.000000e-10 : f32
    %12 = vector.broadcast %cst_6 : f32 to vector<8x8xf32>
    %13 = arith.addf %11, %12 : vector<8x8xf32>
    %14 = vector.shape_cast %13 : vector<8x8xf32> to vector<8x8x1xf32>
    %15 = vector.broadcast %14 : vector<8x8x1xf32> to vector<8x8x32xf32>
    %16 = arith.mulf %0, %15 : vector<8x8x32xf32>
    %cst_7 = arith.constant dense<0.000000e+00> : vector<8x32xf32>
    %17 = vector.multi_reduction <add>, %16, %cst_7 [1] : vector<8x8x32xf32> to vector<8x32xf32>
    %c0_8 = arith.constant 0 : index
    %c0_9 = arith.constant 0 : index
    %18 = vector.load %arg3[%c0_8, %c0_9] : memref<8x32xf32, #tpu.memory_space<vmem>>, vector<8x32xf32>
    tpu.vector_store %arg3[%c0_8, %c0_9], %17 {strides = array<i32>} : memref<8x32xf32, #tpu.memory_space<vmem>>, vector<8x32xf32>,
    %c0_10 = arith.constant 0 : index
    %c0_11 = arith.constant 0 : index
    %19 = vector.load %arg4[%c0_10, %c0_11] : memref<8x8xf32, #tpu.memory_space<vmem>>, vector<8x8xf32>
    tpu.vector_store %arg4[%c0_10, %c0_11], %13 {strides = array<i32>} : memref<8x8xf32, #tpu.memory_space<vmem>>, vector<8x8xf32>,
    return
  }
  func.func @transform_0(%arg0: i32) -> (i32, i32, i32) {
    %c0_i32 = arith.constant 0 : i32
    %c0_i32_0 = arith.constant 0 : i32
    %c0_i32_1 = arith.constant 0 : i32
    return %arg0, %c0_i32, %c0_i32_0 : i32, i32, i32
  }
  func.func @transform_1(%arg0: i32) -> (i32, i32, i32) {
    %c0_i32 = arith.constant 0 : i32
    %c0_i32_0 = arith.constant 0 : i32
    %c0_i32_1 = arith.constant 0 : i32
    %c0_i32_2 = arith.constant 0 : i32
    return %c0_i32, %c0_i32_0, %c0_i32_1 : i32, i32, i32
  }
  func.func @transform_2(%arg0: i32) -> (i32, i32) {
    %c0_i32 = arith.constant 0 : i32
    %c0_i32_0 = arith.constant 0 : i32
    return %arg0, %c0_i32 : i32, i32
  }
  func.func @transform_3(%arg0: i32) -> (i32, i32) {
    %c0_i32 = arith.constant 0 : i32
    %c0_i32_0 = arith.constant 0 : i32
    return %arg0, %c0_i32 : i32, i32
  }
}

</mosaic_0001>

<bundles_post_ra>
// kernel: tpu_custom_call.1
= control target key start
LH: loop header
LB: loop body
LE: loop exit
PB: predicated region body
PF: predicated region fallthrough
CT: control target
= control target key end

     0   :  { %9 = vsyncpa [#allocation3], 0  ;;  %s1148_s0 = inlined_call_operand.hbm [shape: f32[16,8,32], index: 0, kind: input, shape index: {}]   ;;  %s1149_s1 = inlined_call_operand.vmem [shape: f32[1,1,32], index: 1, kind: input, shape index: {}]   ;;  %s1150_s2 = inlined_call_operand.hbm [shape: f32[16,32], index: 2, kind: output, shape index: {0}]   ;;  %s1151_s3 = inlined_call_operand.vmem [shape: f32[16,8], index: 3, kind: output, shape index: {1}]  }
   0x1   :  { %11 = vsyncpa [#allocation3 + $0x1], 0 }
   0x2   :  { %12 = vsyncpa [#allocation4], 0 }
   0x3   :  { %14 = vsyncpa [#allocation4 + $0x1], 0  ;;  %s889_s12 = smov 0   ;;  %s891_s13 = smov 0  }
   0x4   :  { %s893_s14 = smov 0   ;;  %s895_s15 = smov 0  }
   0x5 LB: > { %s910_s16 = sadd.s32 4294967295, %s862_s15   ;;  %s669_s17 = sadd.s32 4294967294, %s862_s15   ;;  %s862_s15 = sphi %s895_s15, %s1166_s15   ;;  %s858_s14 = sphi %s893_s14, %s1165_s14   ;;  %s854_s13 = sphi %s891_s13, %s1164_s13   ;;  %s850_s12 = sphi %s889_s12, %s1163_s12  }
   0x6   : > { %s914_s18 = sadd.s32 1, %s862_s15   ;;  %s27_s19 = sadd.s32 1, %s858_s14 }
   0x7   : > { %s24_s20 = ssub.s32 %s862_s15, %s914_s18  ;;  %p34_p0 = scmp.ne.s32.totalorder %s858_s14, %s854_s13 }
   0x8   : > { %p25_p1 = scmp.eq.s32.totalorder %s24_s20, 0  ;;  %p35_p2 = scmp.eq.s32.totalorder %s862_s15, 0 }
   0x9   : > { %p40_p3 = scmp.ne.s32.totalorder %s854_s13, %s850_s12  ;;  %p41_p4 = scmp.eq.s32.totalorder %s910_s16, 0 }
   0xa   : > { %s926_s21 = scalar_select %p25_p1, %s858_s14, %s27_s19  }
   0xb   : > { %p928_p5 = por %p35_p2, %p34_p0  ;;  %p932_p6 = por %p41_p4, %p40_p3 }
   0xc   : > { %p85_p7 = scmp.eq.s32.totalorder %s910_s16, 1  ;;  %p91_p8 = scmp.eq.s32.totalorder %s669_s17, 1 }
   0xd   : > { %s1155_s23 = scalar_select %p932_p6, 1, 0 }
   0xe   : > { %p697_p10 = scmp.lt.s32.totalorder %s862_s15, 2  ;;  %p939_p11 = por %p85_p7, %p34_p0 }
   0xf   : > { %p943_p12 = por %p91_p8, %p40_p3  ;;  %s140_s26 = sand.u32 1, %s858_s14  }
  0x10   : > { %s1156_s24 = scalar_select %p939_p11, 1, 0 }
  0x11   : > { %s1157_s25 = scalar_select %p943_p12, 1, 0 }
  0x12   : > { %s684_s27 = sshll.u32 %s862_s15, 10  ;;  %s672_s28 = sshll.u32 %s140_s26, 6 }
  0x13   : > { %s952_s4 = scalar_lea.hbm %s1148_s0, %s684_s27  ;;  %s144_s5 = scalar_lea.vmem [#allocation2], %s672_s28 }
  0x14   : > { %s151_s6 = sshll.u32 %s144_s5, 4  ;;  %p956_p13 = pnand %p697_p10, %p928_p5  ;;  %s960_s6 = int_to_ptr.vmem [resolvable:$true] %s151_s6 }
  0x15   : > { %s962_s8 = scalar_lea.sflag [#allocation3], %s140_s26  ;;  %s770_s9 = scalar_lea.hbm %s952_s4, 1024 }
  0x16   : > { %p771_p0 = scmp.ne.s32.totalorder %s952_s4, %s770_s9  ;;  %p772_p1 = pneg %p956_p13 }
  0x17   : > { %s775_s17 = scalar_lea.hbm %s1148_s0, 2048  ;;  %p776_p4 = scmp.lt.s32.totalorder %s952_s4, %s1148_s0 }
  0x18   : > { %p773_p2 = pnand %p772_p1, %p771_p0  ;;  %p777_p5 = scmp.lt.s32.totalorder %s775_s17, %s770_s9 }
  0x1a   : > { %p774_p3 = pneg %p773_p2  ;;  %p778_p7 = por %p777_p5, %p776_p4 }
  0x1c   : > { %p779_p8 = pnand %p778_p7, %p774_p3 }
  0x1e   : > { %782 = shalt.err (!%p779_p8)
}
  0x1f   : > { %s783_s22 = scalar_lea.vmem %s960_s6, 1024  ;;  %s864_s26 = smov [#allocation2]  }
  0x20   : > { %p784_p10 = scmp.ne.s32.totalorder %s960_s6, %s783_s22  ;;  %s788_s27 = sshll.u32 %s864_s26, 4  ;;  %s789_s27 = int_to_ptr.vmem [resolvable:$false] %s788_s27 }
  0x21   : > { %s790_s28 = scalar_lea.vmem %s789_s27, 2048  ;;  %p791_p2 = scmp.lt.s32.totalorder %s960_s6, %s789_s27 }
  0x22   : > { %p786_p9 = pnand %p784_p10, %p772_p1  ;;  %p792_p12 = scmp.lt.s32.totalorder %s790_s28, %s783_s22 }
  0x24   : > { %p787_p0 = pneg %p786_p9  ;;  %p793_p11 = por %p792_p12, %p791_p2 }
  0x26   : > { %p794_p6 = pnand %p793_p11, %p787_p0 }
  0x28   : > { %797 = shalt.err (!%p794_p6)
}
  0x29   : > { %s865_s29 = smov 128   ;;  %s866_s30 = smov 8  }
  0x2a   : > { %692 = dma.hbm_to_vmem [thread:$0]  (!%p956_p13), %s952_s4, 1024, %s960_s6, %s962_s8, %s865_s29, %s865_s29, %s866_s30  }
  0x2b   : > { %p675_p9 = scmp.ge.s32.totalorder %s862_s15, 1  ;;  %p159_p1 = scmp.lt.s32.totalorder %s862_s15, 3 }
  0x2d   : > { %p160_p3 = pnand %p675_p9, %p159_p1 }
  0x2e   : > { %s986_s5 = sand.u32 (!%p160_p3), 1, %s854_s13   ;;  %p1159_p6 = scmp.ne.s32.totalorder (!%p160_p3), %s1155_s23, 0 }
  0x2f   : > { %163 = sbr.rel (%p160_p3) target bundleno = 578 (0x242), region = 28  ;;  %s676_s9 = sshll.u32 (!%p160_p3), %s986_s5, 6 }
  0x30   : > { %s166_s10 = scalar_lea.sflag (!%p160_p3), [#allocation3], %s986_s5  ;;  %s169_s11 = scalar_lea.vmem (!%p160_p3), [#allocation2], %s676_s9 }
  0x34   : > { %841 = dma.done.wait (%p1159_p6), %s166_s10, 1024  }
  0x35   : > { %843 = vsyncadd (%p1159_p6), %s166_s10, 4294966272  ;;  %v994_v0 = vld [vmem:[%s169_s11] sm:$0xff]  ;;  %vm224_vm0 = vcmask 261120   ;;  %v999_v2 = vld [vmem:[%s169_s11 + $0x10] sm:$0xff]  ;;  %v281_v43 = vlaneseq  ;;  %vm315_vm1 = vcmask 1041409   ;;  %vm317_vm2 = vcmask 1042434  }
  0x36   : > { %v679_v1 = vld [vmem:[%s1149_s1] ss:$0 sm:$0xff]  ;;  %v1003_v5 = vld [vmem:[%s169_s11 + $0x8] sm:$0xff]  ;;  %v1005_v6 = vld [vmem:[%s169_s11 + $0x18] sm:$0xff]  ;;  %vm319_vm3 = vcmask 1043459   ;;  %vm321_vm4 = vcmask 1044484  }
  0x37   : > { %v216_v3 = vmul.f32 %v679_v1, %v994_v0  ;;  %v218_v4 = vmul.f32 %v679_v1, %v999_v2  ;;  %v217_v7 = vmul.f32 %v679_v1, %v1003_v5  ;;  %v219_v8 = vmul.f32 %v679_v1, %v1005_v6  ;;  %v1009_v9 = vld [vmem:[%s169_s11 + $0x20] sm:$0xff]  ;;  %v1011_v10 = vld [vmem:[%s169_s11 + $0x28] sm:$0xff]  ;;  %v1019_v17 = vld [vmem:[%s169_s11 + $0x30] sm:$0xff]  ;;  %p197_p11 = scmp.lt.s32.totalorder %s910_s16, 1  ;;  %s677_s20 = sshll.u32 %s986_s5, 3 }
  0x38   : > { %v220_v15 = vmul.f32 %v679_v1, %v1009_v9  ;;  %v221_v16 = vmul.f32 %v679_v1, %v1011_v10  ;;  %v1021_v18 = vld [vmem:[%s169_s11 + $0x38] sm:$0xff]  ;;  %v222_v21 = vmul.f32 %v679_v1, %v1019_v17  ;;  %v282_v48 = vand.u32 127, %v281_v43  ;;  %s681_s22 = sshll.u32 %s910_s16, 7  ;;  %s189_s26 = scalar_lea.vmem [#allocation5], %s677_s20 }
  0x39   : > { %v225_v11 = vsel %vm224_vm0, %v216_v3, 0.0  ;;  %v231_v12 = vsel %vm224_vm0, %v218_v4, 0.0  ;;  %v228_v13 = vsel %vm224_vm0, %v217_v7, 0.0  ;;  %v234_v14 = vsel %vm224_vm0, %v219_v8, 0.0  ;;  %s1074_s23 = scalar_select %p197_p11, %s910_s16, 1 }
  0x3a   : > { %226 = vadd.xlane.f32.xlu0 %v225_v11  ;;  %232 = vadd.xlane.f32.xlu1 %v231_v12  ;;  %v237_v19 = vsel %vm224_vm0, %v220_v15, 0.0  ;;  %v240_v20 = vsel %vm224_vm0, %v221_v16, 0.0  ;;  %v223_v22 = vmul.f32 %v679_v1, %v1021_v18  ;;  %v243_v23 = vsel %vm224_vm0, %v222_v21, 0.0  ;;  %s572_s27 = sshll.u32 %s189_s26, 4  ;;  %s1109_s30 = scalar_lea.hbm %s1150_s2, %s681_s22  ;;  %s573_s27 = int_to_ptr.vmem [resolvable:$true] %s572_s27 }
  0x3b   : > { %v1029_v49 = vshrl.u32 %v281_v43, 7  ;;  %vm323_vm5 = vcmask 1045509   ;;  %vm325_vm6 = vcmask 1046534   ;;  %vm327_vm7 = vcmask 1047559   ;;  %s678_s7 = sshll.u32 %s1074_s23, 3  ;;  %s555_s16 = scalar_lea.sflag [#allocation4], %s986_s5 }
  0x3c   : > { %v246_v24 = vsel %vm224_vm0, %v223_v22, 0.0  ;;  %vm330_vm8 = vcmask 64512   ;;  %v867_v21 = vmov 0   ;;  %s200_s19 = scalar_lea.vmem %s1151_s3, %s678_s7  ;;  %s798_s9 = scalar_lea.vmem %s573_s27, 128 }
  0x3d   : > { %v1032_v52 = vsub.s32 %v282_v48, %v1029_v49  ;;  %735 = vset.pattern.permute.xlu0 %v867_v21  ;;  %734 = vset.pattern.permute.xlu1 %v867_v21  ;;  %p799_p12 = scmp.ne.s32.totalorder %s573_s27, %s798_s9  ;;  %p1160_p13 = scmp.ne.s32.totalorder %s1156_s24, 0 }
  0x3e   : > { %229 = vadd.xlane.f32.xlu0 %v228_v13  ;;  %235 = vadd.xlane.f32.xlu1 %v234_v14  ;;  %s868_s10 = smov [#allocation5]  }
  0x3f   : > { %p800_p4 = pnand %p799_p12, %p1160_p13  ;;  %s802_s11 = sshll.u32 %s868_s10, 4  ;;  %s803_s11 = int_to_ptr.vmem [resolvable:$false] %s802_s11 }
  0x40   : > { %s804_s4 = scalar_lea.vmem %s803_s11, 256  ;;  %p805_p7 = scmp.lt.s32.totalorder %s573_s27, %s803_s11 }
  0x41   : > { %p801_p5 = pneg %p800_p4  ;;  %p806_p8 = scmp.lt.s32.totalorder %s804_s4, %s798_s9 }
  0x42   : > { %238 = vadd.xlane.f32.xlu0 %v237_v19  ;;  %241 = vadd.xlane.f32.xlu1 %v240_v20 }
  0x43   : > { %p807_p10 = por %p806_p8, %p805_p7 }
  0x45   : > { %p808_p0 = pnand %p807_p10, %p801_p5 }
  0x46   : > { %244 = vadd.xlane.f32.xlu0 %v243_v23  ;;  %247 = vadd.xlane.f32.xlu1 %v246_v24  ;;  %v342_v23 = vsub.s32 1, %v1029_v49  ;;  %v338_v24 = vsub.s32 0, %v1029_v49 }
  0xc3   : > { %v227_v25 = vpop.xlane.xlu0 %226  ;;  %v233_v26 = vpop.xlane.xlu1 %232 }
  0xc4   : > { %736 = vtanh.f32 %v227_v25  ;;  %v346_v25 = vsub.s32 2, %v1029_v49 }
  0xc5   : > { %738 = vtanh.f32 %v233_v26 }
  0xc7   : > { %v230_v27 = vpop.xlane.xlu0 %229  ;;  %v236_v28 = vpop.xlane.xlu1 %235 }
  0xc8   : > { %740 = vtanh.f32 %v230_v27 }
  0xc9   : > { %742 = vtanh.f32 %v236_v28 }
  0xcb   : > { %v239_v29 = vpop.xlane.xlu0 %238  ;;  %v242_v30 = vpop.xlane.xlu1 %241 }
  0xcc   : > { %744 = vtanh.f32 %v239_v29 }
  0xcd   : > { %746 = vtanh.f32 %v242_v30  ;;  %v350_v30 = vsub.s32 3, %v1029_v49 }
  0xcf   : > { %v245_v31 = vpop.xlane.xlu0 %244  ;;  %v248_v32 = vpop.xlane.xlu1 %247 }
  0xd0   : > { %748 = vtanh.f32 %v245_v31 }
  0xd1   : > { %v737_v33 = vpop.eup %736  ;;  %750 = vtanh.f32 %v248_v32 }
  0xd2   : > { %v739_v34 = vpop.eup %738  ;;  %v257_v35 = vmul.f32 1.442695, %v737_v33  ;;  %v354_v33 = vsub.s32 4, %v1029_v49 }
  0xd3   : > { %v261_v36 = vmul.f32 1.442695, %v739_v34 }
  0xd4   : > { %752 = vpow2.f32 %v257_v35 }
  0xd5   : > { %v741_v37 = vpop.eup %740  ;;  %754 = vpow2.f32 %v261_v36 }
  0xd6   : > { %v743_v38 = vpop.eup %742  ;;  %v259_v39 = vmul.f32 1.442695, %v741_v37 }
  0xd7   : > { %v263_v40 = vmul.f32 1.442695, %v743_v38 }
  0xd8   : > { %756 = vpow2.f32 %v259_v39 }
  0xd9   : > { %v745_v41 = vpop.eup %744  ;;  %758 = vpow2.f32 %v263_v40 }
  0xda   : > { %v747_v42 = vpop.eup %746  ;;  %v265_v44 = vmul.f32 1.442695, %v745_v41  ;;  %v358_v41 = vsub.s32 5, %v1029_v49 }
  0xdb   : > { %v267_v45 = vmul.f32 1.442695, %v747_v42 }
  0xdc   : > { %760 = vpow2.f32 %v265_v44 }
  0xdd   : > { %v749_v46 = vpop.eup %748  ;;  %762 = vpow2.f32 %v267_v45  ;;  %v362_v45 = vsub.s32 6, %v1029_v49 }
  0xde   : > { %v751_v47 = vpop.eup %750  ;;  %v269_v50 = vmul.f32 1.442695, %v749_v46 }
  0xdf   : > { %v271_v51 = vmul.f32 1.442695, %v751_v47 }
  0xe0   : > { %764 = vpow2.f32 %v269_v50  ;;  %v366_v50 = vsub.s32 7, %v1029_v49 }
  0xe1   : > { %766 = vpow2.f32 %v271_v51  ;;  %v753_v53 = vpop.eup %752 }
  0xe2   : > { %v755_v54 = vpop.eup %754  ;;  %v286_v57 = vrot.slane %v753_v53, %v1032_v52 }
  0xe3   : > { %v294_v59 = vrot.slane %v755_v54, %v1032_v52 }
  0xe5   : > { %v757_v55 = vpop.eup %756 }
  0xe6   : > { %v759_v56 = vpop.eup %758  ;;  %v290_v58 = vrot.slane %v757_v55, %v1032_v52 }
  0xe7   : > { %v298_v60 = vrot.slane %v759_v56, %v1032_v52 }
  0xe8   : > { %v316_v61 = vsel %vm315_vm1, %v290_v58, %v286_v57 }
  0xe9   : > { %v761_v62 = vpop.eup %760  ;;  %v318_v63 = vsel %vm317_vm2, %v294_v59, %v316_v61 }
  0xea   : > { %v763_v1 = vpop.eup %762  ;;  %v302_v3 = vrot.slane %v761_v62, %v1032_v52  ;;  %v320_v4 = vsel %vm319_vm3, %v298_v60, %v318_v63 }
  0xeb   : > { %v306_v7 = vrot.slane %v763_v1, %v1032_v52 }
  0xec   : > { %v322_v8 = vsel %vm321_vm4, %v302_v3, %v320_v4 }
  0xed   : > { %v765_v11 = vpop.eup %764  ;;  %v324_v15 = vsel %vm323_vm5, %v306_v7, %v322_v8 }
  0xee   : > { %v767_v12 = vpop.eup %766  ;;  %v310_v13 = vrot.slane %v765_v11, %v1032_v52 }
  0xef   : > { %v314_v14 = vrot.slane %v767_v12, %v1032_v52 }
  0xf0   : > { %v326_v16 = vsel %vm325_vm6, %v310_v13, %v324_v15 }
  0xf1   : > { %v328_v19 = vsel %vm327_vm7, %v314_v14, %v326_v16 }
  0xf2   : > { %v331_v20 = vsel %vm330_vm8, %v328_v19, 0.0 }
  0xf3   : > { %332 = vadd.xlane.f32.xlu0 %v331_v20 }
 0x17c   : > { %v333_v22 = vpop.xlane.xlu0 %332 }
 0x17d   : > { %768 = vrcp.f32 %v333_v22 }
 0x18a   : > { %v769_v26 = vpop.eup %768 }
 0x18b   : > { %v343_v27 = vrot.slane %v769_v26, %v342_v23  ;;  %v339_v28 = vrot.slane %v769_v26, %v338_v24  ;;  %v347_v29 = vrot.slane %v769_v26, %v346_v25  ;;  %v351_v37 = vrot.slane %v769_v26, %v350_v30 }
 0x18c   : > { %v355_v40 = vrot.slane %v769_v26, %v354_v33  ;;  %v359_v44 = vrot.slane %v769_v26, %v358_v41  ;;  %v363_v48 = vrot.slane %v769_v26, %v362_v45 }
 0x18d   : > { %v377_v31 = vmul.f32 %v757_v55, %v343_v27  ;;  %v376_v32 = vmul.f32 %v753_v53, %v339_v28  ;;  %v378_v36 = vmul.f32 %v755_v54, %v347_v29  ;;  %v379_v39 = vmul.f32 %v759_v56, %v351_v37 }
 0x18e   : > { %v380_v43 = vmul.f32 %v761_v62, %v355_v40  ;;  %v381_v47 = vmul.f32 %v763_v1, %v359_v44  ;;  %v382_v53 = vmul.f32 %v765_v11, %v363_v48  ;;  %v367_v54 = vrot.slane %v769_v26, %v366_v50 }
 0x18f   : > { %v385_v34 = vadd.f32 1e-10, %v377_v31  ;;  %v384_v35 = vadd.f32 1e-10, %v376_v32  ;;  %v386_v38 = vadd.f32 1e-10, %v378_v36 }
 0x190   : > { %v387_v42 = vadd.f32 1e-10, %v379_v39  ;;  %v388_v46 = vadd.f32 1e-10, %v380_v43  ;;  %v389_v51 = vadd.f32 1e-10, %v381_v47  ;;  %v383_v56 = vmul.f32 %v767_v12, %v367_v54 }
 0x191   : > { %399 = vperm.xlu0 %735, %v385_v34   ;;  %394 = vperm.xlu1 %734, %v384_v35   ;;  %v390_v55 = vadd.f32 1e-10, %v382_v53 }
 0x192   : > { %v391_v57 = vadd.f32 1e-10, %v383_v56 }
 0x195   : > { %404 = vperm.xlu1 %734, %v386_v38  }
 0x199   : > { %409 = vperm.xlu1 %734, %v387_v42  }
 0x19d   : > { %414 = vperm.xlu1 %734, %v388_v46  }
 0x1a1   : > { %419 = vperm.xlu1 %734, %v389_v51  }
 0x1a5   : > { %424 = vperm.xlu1 %734, %v390_v55  }
 0x1a9   : > { %429 = vperm.xlu1 %734, %v391_v57  }
 0x20c   : > { %v400_v58 = vpop.permute.xlu0 %399  ;;  %v395_v59 = vpop.permute.xlu1 %394 }
 0x20d   : > { %v433_v60 = vmul.f32 %v400_v58, %v1003_v5  ;;  %v432_v61 = vmul.f32 %v395_v59, %v994_v0  ;;  %v516_v24 = vrot.slane %v395_v59, %v1032_v52 }
 0x20f   : > { %v447_v62 = vsel %vm224_vm0, %v433_v60, 0.0  ;;  %v440_v3 = vsel %vm224_vm0, %v432_v61, 0.0 }
 0x210   : > { %v405_v49 = vpop.permute.xlu1 %404  ;;  %v448_v1 = vrot.slane %v447_v62, 4  ;;  %v441_v11 = vrot.slane %v440_v3, 4 }
 0x211   : > { %v434_v63 = vmul.f32 %v405_v49, %v999_v2  ;;  %v524_v27 = vrot.slane %v405_v49, %v1032_v52 }
 0x212   : > { %v449_v12 = vadd.f32 %v448_v1, %v447_v62  ;;  %v442_v16 = vadd.f32 %v441_v11, %v440_v3 }
 0x213   : > { %v454_v4 = vsel %vm224_vm0, %v434_v63, 0.0 }
 0x214   : > { %v410_v7 = vpop.permute.xlu1 %409  ;;  %v455_v13 = vrot.slane %v454_v4, 4  ;;  %v450_v2 = vrot.slane %v449_v12, 2  ;;  %v443_v26 = vrot.slane %v442_v16, 2 }
 0x215   : > { %v435_v8 = vmul.f32 %v410_v7, %v1005_v6  ;;  %v520_v6 = vrot.slane %v400_v58, %v1032_v52  ;;  %v528_v30 = vrot.slane %v410_v7, %v1032_v52 }
 0x216   : > { %v456_v19 = vadd.f32 %v455_v13, %v454_v4  ;;  %v444_v39 = vadd.f32 %v443_v26, %v442_v16 }
 0x217   : > { %v461_v5 = vsel %vm224_vm0, %v435_v8, 0.0 }
 0x218   : > { %v462_v0 = vrot.slane %v461_v5, 4  ;;  %v415_v14 = vpop.permute.xlu1 %414  ;;  %v457_v29 = vrot.slane %v456_v19, 2  ;;  %v445_v57 = vrot.slane %v444_v39, 1 }
 0x219   : > { %v436_v15 = vmul.f32 %v415_v14, %v1009_v9  ;;  %v451_v9 = vadd.f32 %v450_v2, %v449_v12  ;;  %v532_v33 = vrot.slane %v415_v14, %v1032_v52 }
 0x21a   : > { %v463_v21 = vadd.f32 %v462_v0, %v461_v5  ;;  %v458_v44 = vadd.f32 %v457_v29, %v456_v19  ;;  %v446_v7 = vadd.f32 %v445_v57, %v444_v39 }
 0x21b   : > { %v468_v20 = vsel %vm224_vm0, %v436_v15, 0.0  ;;  %v452_v43 = vrot.slane %v451_v9, 1 }
 0x21c   : > { %v469_v22 = vrot.slane %v468_v20, 4  ;;  %v420_v23 = vpop.permute.xlu1 %419  ;;  %v464_v32 = vrot.slane %v463_v21, 2  ;;  %v459_v61 = vrot.slane %v458_v44, 1 }
 0x21d   : > { %v437_v25 = vmul.f32 %v420_v23, %v1011_v10  ;;  %v545_v10 = vsel %vm315_vm1, %v520_v6, %v516_v24  ;;  %v536_v37 = vrot.slane %v420_v23, %v1032_v52  ;;  %v453_v4 = vadd.f32 %v452_v43, %v451_v9 }
 0x21e   : > { %v470_v28 = vadd.f32 %v469_v22, %v468_v20  ;;  %v546_v40 = vsel %vm317_vm2, %v524_v27, %v545_v10  ;;  %v465_v47 = vadd.f32 %v464_v32, %v463_v21  ;;  %v460_v12 = vadd.f32 %v459_v61, %v458_v44 }
 0x21f   : > { %v475_v31 = vsel %vm224_vm0, %v437_v25, 0.0  ;;  %v547_v45 = vsel %vm319_vm3, %v528_v30, %v546_v40  ;;  %v504_v15 = vsel %vm315_vm1, %v453_v4, %v446_v7 }
 0x220   : > { %v476_v34 = vrot.slane %v475_v31, 4  ;;  %v425_v35 = vpop.permute.xlu1 %424  ;;  %v471_v36 = vrot.slane %v470_v28, 2  ;;  %v548_v48 = vsel %vm321_vm4, %v532_v33, %v547_v45  ;;  %v466_v63 = vrot.slane %v465_v47, 1 }
 0x221   : > { %v438_v38 = vmul.f32 %v425_v35, %v1019_v17  ;;  %v540_v42 = vrot.slane %v425_v35, %v1032_v52  ;;  %v549_v54 = vsel %vm323_vm5, %v536_v37, %v548_v48  ;;  %v505_v19 = vsel %vm317_vm2, %v460_v12, %v504_v15 }
 0x222   : > { %v477_v41 = vadd.f32 %v476_v34, %v475_v31  ;;  %v472_v17 = vadd.f32 %v471_v36, %v470_v28  ;;  %v467_v13 = vadd.f32 %v466_v63, %v465_v47 }
 0x223   : > { %v482_v46 = vsel %vm224_vm0, %v438_v38, 0.0  ;;  %v550_v60 = vsel %vm325_vm6, %v540_v42, %v549_v54 }
 0x224   : > { %v478_v50 = vrot.slane %v477_v41, 2  ;;  %v483_v51 = vrot.slane %v482_v46, 4  ;;  %v430_v53 = vpop.permute.xlu1 %429  ;;  %v506_v21 = vsel %vm319_vm3, %v467_v13, %v505_v19 }
 0x225   : > { %v439_v55 = vmul.f32 %v430_v53, %v1021_v18  ;;  %v544_v56 = vrot.slane %v430_v53, %v1032_v52  ;;  %v473_v18 = vrot.slane %v472_v17, 1 }
 0x226   : > { %v479_v58 = vadd.f32 %v478_v50, %v477_v41  ;;  %v484_v59 = vadd.f32 %v483_v51, %v482_v46 }
 0x227   : > { %v489_v62 = vsel %vm224_vm0, %v439_v55, 0.0  ;;  %v551_v49 = vsel %vm327_vm7, %v544_v56, %v550_v60  ;;  %v474_v14 = vadd.f32 %v473_v18, %v472_v17 }
 0x228   : > { %v485_v1 = vrot.slane %v484_v59, 2  ;;  %v490_v3 = vrot.slane %v489_v62, 4  ;;  %553 = vst.msk [vmem:[%s200_s19] sm:$0xff] %vm330_vm8, %v551_v49  ;;  %v480_v52 = vrot.slane %v479_v58, 1 }
 0x229   : > { %v507_v23 = vsel %vm321_vm4, %v474_v14, %v506_v21 }
 0x22a   : > { %v486_v8 = vadd.f32 %v485_v1, %v484_v59  ;;  %v491_v11 = vadd.f32 %v490_v3, %v489_v62  ;;  %v481_v16 = vadd.f32 %v480_v52, %v479_v58 }
 0x22c   : > { %v487_v5 = vrot.slane %v486_v8, 1  ;;  %v492_v0 = vrot.slane %v491_v11, 2  ;;  %v508_v6 = vsel %vm323_vm5, %v481_v16, %v507_v23 }
 0x22e   : > { %v493_v2 = vadd.f32 %v492_v0, %v491_v11  ;;  %v488_v20 = vadd.f32 %v487_v5, %v486_v8 }
 0x230   : > { %v494_v22 = vrot.slane %v493_v2, 1  ;;  %v509_v25 = vsel %vm325_vm6, %v488_v20, %v508_v6 }
 0x232   : > { %v495_v24 = vadd.f32 %v494_v22, %v493_v2 }
 0x234   : > { %v510_v26 = vsel %vm327_vm7, %v495_v24, %v509_v25 }
 0x235   : > { %512 = vst.msk [vmem:[%s189_s26] sm:$0xff] %vm224_vm0, %v510_v26 }
 0x236   : > { %811 = shalt.err (!%p808_p0)
}
 0x237   : > { %s812_s6 = scalar_lea.hbm %s1109_s30, 128  ;;  %s816_s7 = scalar_lea.hbm %s1150_s2, 256 }
 0x238   : > { %p813_p2 = scmp.ne.s32.totalorder %s1109_s30, %s812_s6  ;;  %p817_p3 = scmp.lt.s32.totalorder %s1109_s30, %s1150_s2 }
 0x239   : > { %p818_p6 = scmp.lt.s32.totalorder %s816_s7, %s812_s6 }
 0x23a   : > { %p814_p9 = pnand %p813_p2, %p1160_p13 }
 0x23b   : > { %p819_p11 = por %p818_p6, %p817_p3 }
 0x23c   : > { %p815_p1 = pneg %p814_p9 }
 0x23e   : > { %p820_p12 = pnand %p819_p11, %p815_p1 }
 0x240   : > { %823 = shalt.err (!%p820_p12)
}
 0x241   : > { %687 = dma.vmem_to_hbm [thread:$0]  (%p1160_p13), %s573_s27, 128, %s1109_s30, %s555_s16  }
 0x242 PF: > { %s587_s19 = sand.u32 1, %s850_s12   ;;  %p1161_p4 = scmp.ne.s32.totalorder %s1157_s25, 0 }
 0x243   : > { %p1162_p5 = scmp.ge.s32.totalorder %s862_s15, 2  ;;  %s588_s20 = scalar_lea.sflag [#allocation4], %s587_s19 }
 0x245   : > { %p694_p7 = pnand %p1162_p5, %p1161_p4 }
 0x247   : > { %p695_p8 = pneg %p694_p7 }
 0x249   : > { %845 = dma.done.wait (%p695_p8), %s588_s20, 128  }
 0x24a   : > { %847 = vsyncadd (%p695_p8), %s588_s20, 4294967168  ;;  %p17_p10 = scmp.ge.s32.totalorder %s914_s18, 4   ;;  %s1163_s12 = smov %s854_s13 }
 0x24b   : > { %s1164_s13 = smov %s858_s14  ;;  %s1165_s14 = smov %s926_s21 }
 0x24c   : > { %s1166_s15 = smov %s914_s18  ;;  %19 = sbr.rel (!%p17_p10) target bundleno = 5 (0x5), region = 85 }
 0x251   :  { %600 = vsyncpa [#allocation3], 1 }
 0x252   :  { %602 = vsyncpa [#allocation3 + $0x1], 1 }
 0x253   :  { %603 = vsyncpa [#allocation4], 1 }
 0x254   :  { %605 = vsyncpa [#allocation4 + $0x1], 1 }

</bundles_post_ra>
